<compile_context>
chip_gen: v6e
topology: v6e:2x2x1
jax: 0.10.0
libtpu: 0.0.40
codegen_flags: <defaults>
</compile_context>

<pallas_src>
import jax
import jax.numpy as jnp
from jax.experimental import pallas as pl
from jax.experimental.pallas import tpu as pltpu

K_RAW, K_PAD = 784, 896        # 7 * 128
H1 = 128
H2_RAW, H2_PAD = 64, 128
C_RAW, C_PAD = 10, 128
NEG_BIAS = -1e30               # padded-class bias: exp() underflows to 0


def _mlp_kernel(x_ref, w1_ref, b1_ref, w2_ref, b2_ref, w3_ref, b3_ref, o_ref):
    # x_ref: (TM, 896) bf16; weights bf16; biases f32 (1, N); out f32 (TM, 128).
    x = x_ref[...]

    h1 = jnp.dot(x, w1_ref[...], preferred_element_type=jnp.float32) + b1_ref[...]
    h1 = jnp.maximum(h1, 0.0)                       # f32 elementwise

    h2 = jnp.dot(h1.astype(jnp.bfloat16), w2_ref[...],
                 preferred_element_type=jnp.float32) + b2_ref[...]
    h2 = jnp.maximum(h2, 0.0)                       # padded cols stay exactly 0

    logits = jnp.dot(h2.astype(jnp.bfloat16), w3_ref[...],
                     preferred_element_type=jnp.float32) + b3_ref[...]

    # log_softmax over the (padded) class dim; padded classes sit at -1e30 so
    # they contribute 0 to the sum and never win the max.
    m = jnp.max(logits, axis=-1, keepdims=True)
    lse = jnp.log(jnp.sum(jnp.exp(logits - m), axis=-1, keepdims=True)) + m
    o_ref[...] = (logits - lse).astype(o_ref.dtype)


def _prep_params(params):
    """Pad + cast PyTorch-equivalent params to kernel layout (done once)."""
    w1, b1, w2, b2, w3, b3 = params

    # Layer 1: (784,128) -> (896,128) bf16, zero-padded K rows.
    w1p = jnp.zeros((K_PAD, H1), jnp.float32).at[:K_RAW, :].set(w1).astype(jnp.bfloat16)
    b1p = b1.reshape(1, H1).astype(jnp.float32)

    # Layer 2: (128,64) -> (128,128) bf16, zero-padded output cols (ReLU keeps
    # the padded activations at exactly 0).
    w2p = jnp.zeros((H1, H2_PAD), jnp.float32).at[:, :H2_RAW].set(w2).astype(jnp.bfloat16)
    b2p = jnp.zeros((1, H2_PAD), jnp.float32).at[0, :H2_RAW].set(b2)

    # Layer 3: (64,10) -> (128,128) bf16; padded input rows are zero (multiply
    # the zero padded h2 cols), padded output cols get a -1e30 bias so the
    # softmax denominator is unchanged.
    w3p = jnp.zeros((H2_PAD, C_PAD), jnp.float32).at[:H2_RAW, :C_RAW].set(w3).astype(jnp.bfloat16)
    b3p = jnp.full((1, C_PAD), NEG_BIAS, jnp.float32).at[0, :C_RAW].set(b3)

    return w1p, b1p, w2p, b2p, w3p, b3p


def classifier_forward(x_nchw, params):
    """x_nchw: (B, 1, 28, 28) float32. Returns log-probs (B, 10) float32."""
    B = x_nchw.shape[0]
    x_flat = jnp.reshape(x_nchw, (B, K_RAW))        # matches torch x.view(B, -1)

    # Batch tile: 256 rows when the batch is large, otherwise round B up to a
    # sublane multiple (8) so block_shape stays (8,128)-aligned.
    TM = 256 if B >= 256 else max(8, ((B + 7) // 8) * 8)
    B_pad = ((B + TM - 1) // TM) * TM
    grid = (B_pad // TM,)

    # Zero-pad batch rows and K columns; cast activations to bf16 for the MXU.
    x_pad = jnp.zeros((B_pad, K_PAD), jnp.float32)
    x_pad = x_pad.at[:B, :K_RAW].set(x_flat).astype(jnp.bfloat16)

    w1p, b1p, w2p, b2p, w3p, b3p = _prep_params(params)

    resident = lambda shape: pl.BlockSpec(shape, lambda i: (0, 0))  # weights stay in VMEM

    out = pl.pallas_call(
        _mlp_kernel,
        out_shape=jax.ShapeDtypeStruct((B_pad, C_PAD), jnp.float32),
        grid=grid,
        in_specs=[
            pl.BlockSpec((TM, K_PAD), lambda i: (i, 0)),   # x tiles stream
            resident(w1p.shape),
            resident(b1p.shape),
            resident(w2p.shape),
            resident(b2p.shape),
            resident(w3p.shape),
            resident(b3p.shape),
        ],
        out_specs=pl.BlockSpec((TM, C_PAD), lambda i: (i, 0)),
        compiler_params=pltpu.CompilerParams(
            dimension_semantics=("parallel",)),            # v7x: shard batch over 2 TCs
    )(x_pad, w1p, b1p, w2p, b2p, w3p, b3p)

    return out[:B, :C_RAW]


def init_params(key):
    """Deterministic synthetic parameters matching nn.Linear shapes.

    Stored as (in_features, out_features) — the transpose of PyTorch's
    (out, in) layout — so the kernel does x @ W + b directly.
    """
    k1, k2, k3 = jax.random.split(key, 3)

    def linear(k, fan_in, fan_out):
        bound = 1.0 / jnp.sqrt(fan_in)
        kw, kb = jax.random.split(k)
        w = jax.random.uniform(kw, (fan_in, fan_out), jnp.float32, -bound, bound)
        b = jax.random.uniform(kb, (fan_out,), jnp.float32, -bound, bound)
        return w, b

    w1, b1 = linear(k1, 784, 128)
    w2, b2 = linear(k2, 128, 64)
    w3, b3 = linear(k3, 64, 10)
    return (w1, b1, w2, b2, w3, b3)


if __name__ == "__main__":
    key = jax.random.PRNGKey(0)
    kx, kp = jax.random.split(key)

    B = 8  # small batch
    x = jax.random.normal(kx, (B, 1, 28, 28), jnp.float32)  # NCHW, Fashion-MNIST shape
    params = init_params(kp)

    out = classifier_forward(x, params)
    out = jax.block_until_ready(out)

    # Reference 1: exact same bf16 dot-input path in pure JAX (tight tolerance).
    w1, b1, w2, b2, w3, b3 = params
    xf = x.reshape(B, 784)
    h = jnp.maximum(
        jnp.dot(xf.astype(jnp.bfloat16), w1.astype(jnp.bfloat16),
                preferred_element_type=jnp.float32) + b1, 0.0)
    h = jnp.maximum(
        jnp.dot(h.astype(jnp.bfloat16), w2.astype(jnp.bfloat16),
                preferred_element_type=jnp.float32) + b2, 0.0)
    logits = jnp.dot(h.astype(jnp.bfloat16), w3.astype(jnp.bfloat16),
                     preferred_element_type=jnp.float32) + b3
    ref_bf16 = jax.nn.log_softmax(logits, axis=-1)

    # Reference 2: full-f32 PyTorch-equivalent forward (loose tolerance: bf16 inputs).
    hf = jnp.maximum(xf @ w1 + b1, 0.0)
    hf = jnp.maximum(hf @ w2 + b2, 0.0)
    ref_f32 = jax.nn.log_softmax(hf @ w3 + b3, axis=-1)

    assert out.shape == (B, 10)
    assert jnp.allclose(out, ref_bf16, atol=1e-3, rtol=1e-3)
    assert jnp.allclose(out, ref_f32, atol=5e-2, rtol=5e-2)

    print("KERNEL_OK")
</pallas_src>

<mosaic_0001>
module attributes {stable_mosaic.version = 11 : i64} {
  func.func @_mlp_kernel(%arg0: i32, %arg1: memref<8x896xbf16, #tpu.memory_space<vmem>>, %arg2: memref<896x128xbf16, #tpu.memory_space<vmem>>, %arg3: memref<1x128xf32, #tpu.memory_space<vmem>>, %arg4: memref<128x128xbf16, #tpu.memory_space<vmem>>, %arg5: memref<1x128xf32, #tpu.memory_space<vmem>>, %arg6: memref<128x128xbf16, #tpu.memory_space<vmem>>, %arg7: memref<1x128xf32, #tpu.memory_space<vmem>>, %arg8: memref<8x128xf32, #tpu.memory_space<vmem>>) attributes {dimension_semantics = [#tpu.dimension_semantics<parallel>], iteration_bounds = array<i64: 1>, scalar_prefetch = 0 : i64, scratch_operands = 0 : i64, tpu.core_type = #tpu.core_type<tc>, window_params = [{transform_indices = @transform_0, window_bounds = array<i64: 8, 896>}, {pipeline_mode = #tpu.pipeline_mode<synchronous>, transform_indices = @transform_1, window_bounds = array<i64: 896, 128>}, {pipeline_mode = #tpu.pipeline_mode<synchronous>, transform_indices = @transform_2, window_bounds = array<i64: 1, 128>}, {pipeline_mode = #tpu.pipeline_mode<synchronous>, transform_indices = @transform_3, window_bounds = array<i64: 128, 128>}, {pipeline_mode = #tpu.pipeline_mode<synchronous>, transform_indices = @transform_4, window_bounds = array<i64: 1, 128>}, {pipeline_mode = #tpu.pipeline_mode<synchronous>, transform_indices = @transform_5, window_bounds = array<i64: 128, 128>}, {pipeline_mode = #tpu.pipeline_mode<synchronous>, transform_indices = @transform_6, window_bounds = array<i64: 1, 128>}, {transform_indices = @transform_7, window_bounds = array<i64: 8, 128>}]} {
    %c0 = arith.constant 0 : index
    %c0_0 = arith.constant 0 : index
    %0 = vector.load %arg1[%c0, %c0_0] : memref<8x896xbf16, #tpu.memory_space<vmem>>, vector<8x896xbf16>
    %c0_1 = arith.constant 0 : index
    %c0_2 = arith.constant 0 : index
    %1 = vector.load %arg2[%c0_1, %c0_2] : memref<896x128xbf16, #tpu.memory_space<vmem>>, vector<896x128xbf16>
    %cst = arith.constant dense<0.000000e+00> : vector<8x128xf32>
    %2 = tpu.matmul %0, %1, %cst {dimension_numbers = #tpu.dot_dimension_numbers<[1], [0], [0], [1], [0, 0, 1, 1], [], []>} : vector<8x896xbf16>, vector<896x128xbf16>, vector<8x128xf32> -> vector<8x128xf32>
    %c0_3 = arith.constant 0 : index
    %c0_4 = arith.constant 0 : index
    %3 = vector.load %arg3[%c0_3, %c0_4] : memref<1x128xf32, #tpu.memory_space<vmem>>, vector<1x128xf32>
    %4 = vector.broadcast %3 : vector<1x128xf32> to vector<8x128xf32>
    %5 = arith.addf %2, %4 : vector<8x128xf32>
    %cst_5 = arith.constant 0.000000e+00 : f32
    %6 = vector.broadcast %cst_5 : f32 to vector<8x128xf32>
    %7 = arith.maximumf %5, %6 : vector<8x128xf32>
    %8 = arith.truncf %7 : vector<8x128xf32> to vector<8x128xbf16>
    %c0_6 = arith.constant 0 : index
    %c0_7 = arith.constant 0 : index
    %9 = vector.load %arg4[%c0_6, %c0_7] : memref<128x128xbf16, #tpu.memory_space<vmem>>, vector<128x128xbf16>
    %cst_8 = arith.constant dense<0.000000e+00> : vector<8x128xf32>
    %10 = tpu.matmul %8, %9, %cst_8 {dimension_numbers = #tpu.dot_dimension_numbers<[1], [0], [0], [1], [0, 0, 1, 1], [], []>} : vector<8x128xbf16>, vector<128x128xbf16>, vector<8x128xf32> -> vector<8x128xf32>
    %c0_9 = arith.constant 0 : index
    %c0_10 = arith.constant 0 : index
    %11 = vector.load %arg5[%c0_9, %c0_10] : memref<1x128xf32, #tpu.memory_space<vmem>>, vector<1x128xf32>
    %12 = vector.broadcast %11 : vector<1x128xf32> to vector<8x128xf32>
    %13 = arith.addf %10, %12 : vector<8x128xf32>
    %cst_11 = arith.constant 0.000000e+00 : f32
    %14 = vector.broadcast %cst_11 : f32 to vector<8x128xf32>
    %15 = arith.maximumf %13, %14 : vector<8x128xf32>
    %16 = arith.truncf %15 : vector<8x128xf32> to vector<8x128xbf16>
    %c0_12 = arith.constant 0 : index
    %c0_13 = arith.constant 0 : index
    %17 = vector.load %arg6[%c0_12, %c0_13] : memref<128x128xbf16, #tpu.memory_space<vmem>>, vector<128x128xbf16>
    %cst_14 = arith.constant dense<0.000000e+00> : vector<8x128xf32>
    %18 = tpu.matmul %16, %17, %cst_14 {dimension_numbers = #tpu.dot_dimension_numbers<[1], [0], [0], [1], [0, 0, 1, 1], [], []>} : vector<8x128xbf16>, vector<128x128xbf16>, vector<8x128xf32> -> vector<8x128xf32>
    %c0_15 = arith.constant 0 : index
    %c0_16 = arith.constant 0 : index
    %19 = vector.load %arg7[%c0_15, %c0_16] : memref<1x128xf32, #tpu.memory_space<vmem>>, vector<1x128xf32>
    %20 = vector.broadcast %19 : vector<1x128xf32> to vector<8x128xf32>
    %21 = arith.addf %18, %20 : vector<8x128xf32>
    %cst_17 = arith.constant dense<0xFF800000> : vector<8xf32>
    %22 = vector.multi_reduction <maximumf>, %21, %cst_17 [1] : vector<8x128xf32> to vector<8xf32>
    %23 = vector.shape_cast %22 : vector<8xf32> to vector<8x1xf32>
    %24 = vector.broadcast %23 : vector<8x1xf32> to vector<8x128xf32>
    %25 = arith.subf %21, %24 : vector<8x128xf32>
    %26 = math.exp %25 : vector<8x128xf32>
    %cst_18 = arith.constant dense<0.000000e+00> : vector<8xf32>
    %27 = vector.multi_reduction <add>, %26, %cst_18 [1] : vector<8x128xf32> to vector<8xf32>
    %28 = vector.shape_cast %27 : vector<8xf32> to vector<8x1xf32>
    %29 = math.log %28 : vector<8x1xf32>
    %30 = arith.addf %29, %23 : vector<8x1xf32>
    %31 = vector.broadcast %30 : vector<8x1xf32> to vector<8x128xf32>
    %32 = arith.subf %21, %31 : vector<8x128xf32>
    %c0_19 = arith.constant 0 : index
    %c0_20 = arith.constant 0 : index
    %33 = vector.load %arg8[%c0_19, %c0_20] : memref<8x128xf32, #tpu.memory_space<vmem>>, vector<8x128xf32>
    tpu.vector_store %arg8[%c0_19, %c0_20], %32 {strides = array<i32>} : memref<8x128xf32, #tpu.memory_space<vmem>>, vector<8x128xf32>,
    return
  }
  func.func @transform_0(%arg0: i32) -> (i32, i32) {
    %c0_i32 = arith.constant 0 : i32
    %c0_i32_0 = arith.constant 0 : i32
    return %arg0, %c0_i32 : i32, i32
  }
  func.func @transform_1(%arg0: i32) -> (i32, i32) {
    %c0_i32 = arith.constant 0 : i32
    %c0_i32_0 = arith.constant 0 : i32
    %c0_i32_1 = arith.constant 0 : i32
    return %c0_i32, %c0_i32_0 : i32, i32
  }
  func.func @transform_2(%arg0: i32) -> (i32, i32) {
    %c0_i32 = arith.constant 0 : i32
    %c0_i32_0 = arith.constant 0 : i32
    %c0_i32_1 = arith.constant 0 : i32
    return %c0_i32, %c0_i32_0 : i32, i32
  }
  func.func @transform_3(%arg0: i32) -> (i32, i32) {
    %c0_i32 = arith.constant 0 : i32
    %c0_i32_0 = arith.constant 0 : i32
    %c0_i32_1 = arith.constant 0 : i32
    return %c0_i32, %c0_i32_0 : i32, i32
  }
  func.func @transform_4(%arg0: i32) -> (i32, i32) {
    %c0_i32 = arith.constant 0 : i32
    %c0_i32_0 = arith.constant 0 : i32
    %c0_i32_1 = arith.constant 0 : i32
    return %c0_i32, %c0_i32_0 : i32, i32
  }
  func.func @transform_5(%arg0: i32) -> (i32, i32) {
    %c0_i32 = arith.constant 0 : i32
    %c0_i32_0 = arith.constant 0 : i32
    %c0_i32_1 = arith.constant 0 : i32
    return %c0_i32, %c0_i32_0 : i32, i32
  }
  func.func @transform_6(%arg0: i32) -> (i32, i32) {
    %c0_i32 = arith.constant 0 : i32
    %c0_i32_0 = arith.constant 0 : i32
    %c0_i32_1 = arith.constant 0 : i32
    return %c0_i32, %c0_i32_0 : i32, i32
  }
  func.func @transform_7(%arg0: i32) -> (i32, i32) {
    %c0_i32 = arith.constant 0 : i32
    %c0_i32_0 = arith.constant 0 : i32
    return %arg0, %c0_i32 : i32, i32
  }
}

</mosaic_0001>

<bundles_post_ra>
// kernel: tpu_custom_call.1
= control target key start
LH: loop header
LB: loop body
LE: loop exit
PB: predicated region body
PF: predicated region fallthrough
CT: control target
= control target key end

     0   :  { %12 = vsyncpa [#allocation3], 0  ;;  %s1527_s0 = inlined_call_operand.hbm [shape: bf16[8,896], index: 0, kind: input, shape index: {}]   ;;  %s1528_s1 = inlined_call_operand.hbm [shape: bf16[896,128], index: 1, kind: input, shape index: {}]   ;;  %s1529_s2 = inlined_call_operand.vmem [shape: f32[1,128], index: 2, kind: input, shape index: {}]   ;;  %s1530_s3 = inlined_call_operand.hbm [shape: bf16[128,128], index: 3, kind: input, shape index: {}]   ;;  %s1531_s4 = inlined_call_operand.vmem [shape: f32[1,128], index: 4, kind: input, shape index: {}]   ;;  %s1532_s5 = inlined_call_operand.hbm [shape: bf16[128,128], index: 5, kind: input, shape index: {}]   ;;  %s1533_s6 = inlined_call_operand.vmem [shape: f32[1,128], index: 6, kind: input, shape index: {}]   ;;  %s1534_s7 = inlined_call_operand.hbm [shape: f32[8,128], index: 7, kind: output, shape index: {}]  }
   0x1   :  { %13 = vsyncpa [#allocation6], 0 }
   0x2   :  { %14 = vsyncpa [#allocation9], 0 }
   0x3   :  { %15 = vsyncpa [#allocation4], 0  ;;  %s1415_s24 = smov [#allocation5]  }
   0x4   :  { %s31_s25 = sshll.u32 %s1415_s24, 4  ;;  %s32_s25 = int_to_ptr.vmem [resolvable:$true] %s31_s25 }
   0x5   :  { %s1315_s26 = scalar_lea.vmem %s32_s25, 7168  ;;  %p1320_p1 = scmp.lt.s32.totalorder %s32_s25, %s32_s25 }
   0x6   :  { %p1316_p0 = scmp.ne.s32.totalorder %s32_s25, %s1315_s26  ;;  %p1321_p2 = scmp.lt.s32.totalorder %s1315_s26, %s1315_s26 }
   0x8   :  { %p1322_p3 = por %p1321_p2, %p1320_p1 }
   0xa   :  { %p1323_p4 = pnand %p1322_p3, %p1316_p0 }
   0xc   :  { %1326 = shalt.err (!%p1323_p4)
}
   0xd   :  { %s1416_s27 = smov 64   ;;  %s1417_s28 = smov 4  }
   0xe   :  { %37 = dma.hbm_to_vmem [thread:$0]  %s1528_s1, 7168, %s32_s25, [#allocation6], %s1416_s27, %s1416_s27, %s1417_s28  }
   0xf   :  { %s1418_s8 = smov [#allocation2]   ;;  %s1419_s10 = smov [#allocation7]  }
  0x10   :  { %s22_s9 = sshll.u32 %s1418_s8, 4  ;;  %s45_s11 = sshll.u32 %s1419_s10, 4  ;;  %s23_s9 = int_to_ptr.vmem [resolvable:$true] %s22_s9  ;;  %s46_s11 = int_to_ptr.vmem [resolvable:$true] %s45_s11 }
  0x11   :  { %s1335_s12 = scalar_lea.vmem %s23_s9, 448  ;;  %p1340_p6 = scmp.lt.s32.totalorder %s23_s9, %s23_s9 }
  0x12   :  { %p1336_p5 = scmp.ne.s32.totalorder %s23_s9, %s1335_s12  ;;  %p1341_p7 = scmp.lt.s32.totalorder %s1335_s12, %s1335_s12 }
  0x14   :  { %p1342_p8 = por %p1341_p7, %p1340_p6 }
  0x16   :  { %p1343_p9 = pnand %p1342_p8, %p1336_p5 }
  0x18   :  { %1346 = shalt.err (!%p1343_p9)
}
  0x19   :  { %25 = dma.hbm_to_vmem [thread:$0]  %s1527_s0, 448, %s23_s9, [#allocation3]  }
  0x1a   :  { %s1355_s15 = scalar_lea.vmem %s46_s11, 1024  ;;  %p1360_p11 = scmp.lt.s32.totalorder %s46_s11, %s46_s11 }
  0x1b   :  { %p1356_p10 = scmp.ne.s32.totalorder %s46_s11, %s1355_s15  ;;  %p1361_p12 = scmp.lt.s32.totalorder %s1355_s15, %s1355_s15 }
  0x1d   :  { %p1362_p13 = por %p1361_p12, %p1360_p11 }
  0x1f   :  { %p1363_p0 = pnand %p1362_p13, %p1356_p10 }
  0x21   :  { %1366 = shalt.err (!%p1363_p0)
}
  0x22   :  { %51 = dma.hbm_to_vmem [thread:$0]  %s1530_s3, 1024, %s46_s11, [#allocation6], %s1416_s27, %s1416_s27, %s1417_s28  }
  0x23   :  { %s1420_s17 = smov [#allocation8]  }
  0x24   :  { %s59_s18 = sshll.u32 %s1420_s17, 4  ;;  %s60_s18 = int_to_ptr.vmem [resolvable:$true] %s59_s18 }
  0x25   :  { %s1375_s19 = scalar_lea.vmem %s60_s18, 1024  ;;  %p1380_p2 = scmp.lt.s32.totalorder %s60_s18, %s60_s18 }
  0x26   :  { %p1376_p1 = scmp.ne.s32.totalorder %s60_s18, %s1375_s19  ;;  %p1381_p3 = scmp.lt.s32.totalorder %s1375_s19, %s1375_s19 }
  0x28   :  { %p1382_p4 = por %p1381_p3, %p1380_p2 }
  0x2a   :  { %p1383_p5 = pnand %p1382_p4, %p1376_p1 }
  0x2c   :  { %1386 = shalt.err (!%p1383_p5)
}
  0x2d   :  { %65 = dma.hbm_to_vmem [thread:$0]  %s1532_s5, 1024, %s60_s18, [#allocation9], %s1416_s27, %s1416_s27, %s1417_s28  }
  0x2e   :  { %1407 = dma.done.wait [#allocation3], 448  }
  0x2f   :  { %1408 = vsyncadd [#allocation3], 4294966848 }
  0x30   :  { %1409 = dma.done.wait [#allocation6], 8192  }
  0x31   :  { %1410 = vsyncadd [#allocation6], 4294959104 }
  0x32   :  { %1411 = dma.done.wait [#allocation9], 1024  }
  0x33   :  { %1412 = vsyncadd [#allocation9], 4294966272  ;;  %v1224_v0 = vld [vmem:[#allocation5 + $0x78] sm:$0xff]   ;;  %v1228_v4 = vld [vmem:[#allocation5 + $0x70] sm:$0xff]   ;;  %v1421_v39 = vmov 0.0   ;;  %vm1422_vm0 = vmmov 0  }
  0x34   :  { %v1225_v1 = vld [vmem:[#allocation5 + $0xf8] sm:$0xff]   ;;  %1062 = vmatprep.subr.bf16.mxu0 %v1224_v0  ;;  %v1229_v5 = vld [vmem:[#allocation5 + $0xf0] sm:$0xff]   ;;  %v1232_v8 = vld [vmem:[#allocation5 + $0x68] sm:$0xff]  }
  0x35   :  { %v1226_v2 = vld [vmem:[#allocation5 + $0x38] sm:$0xff]   ;;  %1084 = vmatprep.subr.bf16.mxu1 %v1225_v1  ;;  %v1230_v6 = vld [vmem:[#allocation5 + $0x30] sm:$0xff]   ;;  %v1233_v9 = vld [vmem:[#allocation5 + $0xe8] sm:$0xff]  }
  0x36   :  { %v1227_v3 = vld [vmem:[#allocation5 + $0xb8] sm:$0xff]   ;;  %1063 = vmatpush3.bf16.msra.mxu0 %v1226_v2  ;;  %v1231_v7 = vld [vmem:[#allocation5 + $0xb0] sm:$0xff]   ;;  %v1234_v10 = vld [vmem:[#allocation5 + $0x28] sm:$0xff]  }
  0x37   :  { %1085 = vmatpush3.bf16.msra.mxu1 %v1227_v3  ;;  %1064 = vmatprep.subr.bf16.mxu0 %v1228_v4  ;;  %v1235_v11 = vld [vmem:[#allocation5 + $0xa8] sm:$0xff]   ;;  %v1236_v12 = vld [vmem:[#allocation5 + $0x60] sm:$0xff]   ;;  %v1240_v16 = vld [vmem:[#allocation5 + $0x58] sm:$0xff]  }
  0x38   :  { %1086 = vmatprep.subr.bf16.mxu1 %v1229_v5  ;;  %v1237_v13 = vld [vmem:[#allocation5 + $0xe0] sm:$0xff]   ;;  %v1241_v17 = vld [vmem:[#allocation5 + $0xd8] sm:$0xff]   ;;  %v1244_v20 = vld [vmem:[#allocation5 + $0x50] sm:$0xff]  }
  0x39   :  { %v1238_v14 = vld [vmem:[#allocation5 + $0x20] sm:$0xff]   ;;  %v1242_v18 = vld [vmem:[#allocation5 + $0x18] sm:$0xff]   ;;  %v1245_v21 = vld [vmem:[#allocation5 + $0xd0] sm:$0xff]  }
  0x3a   :  { %1065 = vmatpush3.bf16.msra.mxu0 %v1230_v6  ;;  %v1239_v15 = vld [vmem:[#allocation5 + $0xa0] sm:$0xff]   ;;  %v1243_v19 = vld [vmem:[#allocation5 + $0x98] sm:$0xff]   ;;  %v1246_v22 = vld [vmem:[#allocation5 + $0x10] sm:$0xff]  }
  0x3b   :  { %1087 = vmatpush3.bf16.msra.mxu1 %v1231_v7  ;;  %1066 = vmatprep.subr.bf16.mxu0 %v1232_v8  ;;  %v1247_v23 = vld [vmem:[#allocation5 + $0x90] sm:$0xff]   ;;  %v1248_v24 = vld [vmem:[#allocation5 + $0x48] sm:$0xff]   ;;  %v1252_v28 = vld [vmem:[#allocation5 + $0x40] sm:$0xff]  }
  0x3c   :  { %1088 = vmatprep.subr.bf16.mxu1 %v1233_v9  ;;  %v1249_v25 = vld [vmem:[#allocation5 + $0xc8] sm:$0xff]   ;;  %v1253_v29 = vld [vmem:[#allocation5 + $0xc0] sm:$0xff]   ;;  %v1260_v38 = vld [vmem:[#allocation5 + $0x178] sm:$0xff]  }
  0x3d   :  { %v1250_v26 = vld [vmem:[#allocation5 + $0x8] sm:$0xff]   ;;  %v1254_v30 = vld [vmem:[#allocation5] sm:$0xff]   ;;  %v1261_v40 = vld [vmem:[#allocation5 + $0x138] sm:$0xff]  }
  0x3e   :  { %1067 = vmatpush3.bf16.msra.mxu0 %v1234_v10  ;;  %v1251_v27 = vld [vmem:[#allocation5 + $0x88] sm:$0xff]   ;;  %v1255_v31 = vld [vmem:[#allocation5 + $0x80] sm:$0xff]   ;;  %v1262_v41 = vld [vmem:[#allocation5 + $0x1b8] sm:$0xff]  }
  0x3f   :  { %1089 = vmatpush3.bf16.msra.mxu1 %v1235_v11  ;;  %1068 = vmatprep.subr.bf16.mxu0 %v1236_v12  ;;  %v81_v32 = vld [vmem:[#allocation2] sm:$0xff]  ;;  %v82_v33 = vld [vmem:[#allocation2 + $0x8] sm:$0xff]  ;;  %v1272_v51 = vld [vmem:[#allocation5 + $0x158] sm:$0xff]  }
  0x40   :  { %1090 = vmatprep.subr.bf16.mxu1 %v1237_v13  ;;  %v981_v34 = vcombine.low %v81_v32, %v81_v32  ;;  %v982_v35 = vcombine.high %v81_v32, %v81_v32  ;;  %v983_v36 = vcombine.low %v82_v33, %v82_v33  ;;  %v984_v37 = vcombine.high %v82_v33, %v82_v33  ;;  %v1263_v42 = vld [vmem:[#allocation5 + $0x170] sm:$0xff]   ;;  %v1266_v45 = vld [vmem:[#allocation5 + $0x168] sm:$0xff]   ;;  %v1269_v48 = vld [vmem:[#allocation5 + $0x160] sm:$0xff]  }
  0x41   :  { %v1264_v43 = vld [vmem:[#allocation5 + $0x130] sm:$0xff]   ;;  %v1267_v46 = vld [vmem:[#allocation5 + $0x128] sm:$0xff]   ;;  %v1270_v49 = vld [vmem:[#allocation5 + $0x120] sm:$0xff]  }
  0x42   :  { %1069 = vmatpush3.bf16.msra.mxu0 %v1238_v14  ;;  %597 = vmatprep.mubr.bf16.mxu0 %v982_v35  ;;  %v1265_v44 = vld [vmem:[#allocation5 + $0x1b0] sm:$0xff]   ;;  %v1268_v47 = vld [vmem:[#allocation5 + $0x1a8] sm:$0xff]   ;;  %v1271_v50 = vld [vmem:[#allocation5 + $0x1a0] sm:$0xff]  }
  0x43   :  { %1091 = vmatpush3.bf16.msra.mxu1 %v1239_v15  ;;  %1070 = vmatprep.subr.bf16.mxu0 %v1240_v16  ;;  %v1273_v52 = vld [vmem:[#allocation5 + $0x118] sm:$0xff]   ;;  %v1275_v54 = vld [vmem:[#allocation5 + $0x150] sm:$0xff]   ;;  %v1278_v57 = vld [vmem:[#allocation5 + $0x148] sm:$0xff]  }
  0x44   :  { %1092 = vmatprep.subr.bf16.mxu1 %v1241_v17  ;;  %637 = vmatprep.mubr.bf16.mxu1 %v984_v37  ;;  %v1274_v53 = vld [vmem:[#allocation5 + $0x198] sm:$0xff]   ;;  %v1276_v55 = vld [vmem:[#allocation5 + $0x110] sm:$0xff]   ;;  %v1279_v58 = vld [vmem:[#allocation5 + $0x108] sm:$0xff]  }
  0x45   :  { %v1277_v56 = vld [vmem:[#allocation5 + $0x190] sm:$0xff]   ;;  %v1280_v59 = vld [vmem:[#allocation5 + $0x188] sm:$0xff]   ;;  %v1281_v61 = vld [vmem:[#allocation5 + $0x140] sm:$0xff]  }
  0x46   :  { %1071 = vmatpush3.bf16.msra.mxu0 %v1242_v18  ;;  %v83_v60 = vld [vmem:[#allocation2 + $0x10] sm:$0xff]  ;;  %v1282_v63 = vld [vmem:[#allocation5 + $0x100] sm:$0xff]   ;;  %v1286_v1 = vld [vmem:[#allocation2 + $0x18] ss:$0 sps:$4 sm:$0xff]  }
  0x47   :  { %1093 = vmatpush3.bf16.msra.mxu1 %v1243_v19  ;;  %1072 = vmatprep.subr.bf16.mxu0 %v1244_v20  ;;  %v986_v62 = vcombine.high %v83_v60, %v83_v60  ;;  %v1283_v0 = vld [vmem:[#allocation5 + $0x180] sm:$0xff]   ;;  %v985_v2 = vcombine.low %v83_v60, %v83_v60  ;;  %v1287_v3 = vld [vmem:[#allocation7 + $0x38] sm:$0xff]   ;;  %v1288_v4 = vld [vmem:[#allocation7 + $0x30] sm:$0xff]  }
  0x48   :  { %1094 = vmatprep.subr.bf16.mxu1 %v1245_v21  ;;  %v1289_v5 = vld [vmem:[#allocation7 + $0x28] sm:$0xff]   ;;  %v1290_v6 = vld [vmem:[#allocation7 + $0x20] sm:$0xff]   ;;  %v1291_v7 = vld [vmem:[#allocation7 + $0x18] sm:$0xff]  }
  0x49   :  { %v1292_v8 = vld [vmem:[#allocation7 + $0x10] sm:$0xff]   ;;  %v1293_v9 = vld [vmem:[#allocation7 + $0x8] sm:$0xff]   ;;  %v1294_v10 = vld [vmem:[#allocation7] sm:$0xff]  }
  0x4a   :  { %1073 = vmatpush3.bf16.msra.mxu0 %v1246_v22  ;;  %v1295_v11 = vld [vmem:[#allocation8 + $0x38] sm:$0xff]   ;;  %v1296_v12 = vld [vmem:[#allocation8 + $0x30] sm:$0xff]   ;;  %v1297_v13 = vld [vmem:[#allocation8 + $0x28] sm:$0xff]  }
  0x4b   :  { %1095 = vmatpush3.bf16.msra.mxu1 %v1247_v23  ;;  %1074 = vmatprep.subr.bf16.mxu0 %v1248_v24  ;;  %v1298_v14 = vld [vmem:[#allocation8 + $0x20] sm:$0xff]   ;;  %v1299_v15 = vld [vmem:[#allocation8 + $0x18] sm:$0xff]   ;;  %v1300_v16 = vld [vmem:[#allocation8 + $0x10] sm:$0xff]  }
  0x4c   :  { %1096 = vmatprep.subr.bf16.mxu1 %v1249_v25 }
  0x4e   :  { %1075 = vmatpush3.bf16.msra.mxu0 %v1250_v26  ;;  %v980_v26 = vld [vmem:[%s1529_s2] ss:$0 sm:$0xff] }
  0x4f   :  { %1097 = vmatpush3.bf16.msra.mxu1 %v1251_v27  ;;  %1076 = vmatprep.subr.bf16.mxu0 %v1252_v28 }
  0x50   :  { %1098 = vmatprep.subr.bf16.mxu1 %v1253_v29 }
  0x52   :  { %1077 = vmatpush3.bf16.msra.mxu0 %v1254_v30 }
  0x53   :  { %1099 = vmatpush3.bf16.msra.mxu1 %v1255_v31  ;;  %1106 = vmatprep.subr.bf16.mxu0 %v1260_v38 }
  0x54   :  { %1155 = vmatprep.subr.bf16.mxu1 %v1421_v39 }
  0x55   :  { %598 = vmatmul.mubr.bf16.vlgmr.msra.gmra.mxu0 %v981_v34 }
  0x56   :  { %638 = vmatmul.mubr.bf16.vlgmr.msra.gmra.mxu1 %v983_v36  ;;  %1107 = vmatpush3.bf16.msra.mxu0 %v1261_v40 }
  0x57   :  { %1156 = vmatpush3.bf16.msra.mxu1 %v1262_v41  ;;  %1108 = vmatprep.subr.bf16.mxu0 %v1263_v42 }
  0x58   :  { %1157 = vmatprep.subr.bf16.mxu1 %v1421_v39  ;;  %1171 = vmatprep.mubr.msk.bf16.mxu1 %vm1422_vm0, %v1421_v39 }
  0x59   :  { %677 = vmatprep.mubr.bf16.mxu0 %v986_v62 }
  0x5a   :  { %1109 = vmatpush3.bf16.msra.mxu0 %v1264_v43 }
  0x5b   :  { %1158 = vmatpush3.bf16.msra.mxu1 %v1265_v44  ;;  %1110 = vmatprep.subr.bf16.mxu0 %v1266_v45  ;;  %v1301_v44 = vld [vmem:[#allocation8 + $0x8] sm:$0xff]   ;;  %v1302_v45 = vld [vmem:[#allocation8] sm:$0xff]  }
  0x5c   :  { %1159 = vmatprep.subr.bf16.mxu1 %v1421_v39 }
  0x5e   :  { %1111 = vmatpush3.bf16.msra.mxu0 %v1267_v46  ;;  %v1044_v46 = vld [vmem:[%s1531_s4] ss:$0 sm:$0xff]  ;;  %s1423_s4 = smov [#allocation10]  }
  0x5f   :  { %1160 = vmatpush3.bf16.msra.mxu1 %v1268_v47  ;;  %1112 = vmatprep.subr.bf16.mxu0 %v1269_v48  ;;  %s969_s24 = sshll.u32 %s1423_s4, 4  ;;  %s970_s24 = int_to_ptr.vmem [resolvable:$true] %s969_s24 }
  0x60   :  { %1161 = vmatprep.subr.bf16.mxu1 %v1421_v39  ;;  %p1392_p7 = scmp.lt.s32.totalorder %s970_s24, %s970_s24 }
  0x62   :  { %1113 = vmatpush3.bf16.msra.mxu0 %v1270_v49 }
  0x63   :  { %1162 = vmatpush3.bf16.msra.mxu1 %v1271_v50  ;;  %1114 = vmatprep.subr.bf16.mxu0 %v1272_v51 }
  0x64   :  { %1163 = vmatprep.subr.bf16.mxu1 %v1421_v39 }
  0x66   :  { %1115 = vmatpush3.bf16.msra.mxu0 %v1273_v52 }
  0x67   :  { %1164 = vmatpush3.bf16.msra.mxu1 %v1274_v53  ;;  %1116 = vmatprep.subr.bf16.mxu0 %v1275_v54  ;;  %v1053_v54 = vld [vmem:[%s1533_s6] ss:$0 sm:$0xff]  ;;  %s1387_s6 = scalar_lea.vmem %s970_s24, 128 }
  0x68   :  { %1165 = vmatprep.subr.bf16.mxu1 %v1421_v39  ;;  %p1388_p6 = scmp.ne.s32.totalorder %s970_s24, %s1387_s6  ;;  %p1393_p8 = scmp.lt.s32.totalorder %s1387_s6, %s1387_s6 }
  0x6a   :  { %1117 = vmatpush3.bf16.msra.mxu0 %v1276_v55  ;;  %p1394_p9 = por %p1393_p8, %p1392_p7 }
  0x6b   :  { %1166 = vmatpush3.bf16.msra.mxu1 %v1277_v56  ;;  %1118 = vmatprep.subr.bf16.mxu0 %v1278_v57 }
  0x6c   :  { %1167 = vmatprep.subr.bf16.mxu1 %v1421_v39  ;;  %p1395_p10 = pnand %p1394_p9, %p1388_p6 }
  0x6e   :  { %1119 = vmatpush3.bf16.msra.mxu0 %v1279_v58 }
  0x6f   :  { %1168 = vmatpush3.bf16.msra.mxu1 %v1280_v59  ;;  %1120 = vmatprep.subr.bf16.mxu0 %v1281_v61 }
  0x70   :  { %1169 = vmatprep.subr.bf16.mxu1 %v1421_v39 }
  0x72   :  { %1121 = vmatpush3.bf16.msra.mxu0 %v1282_v63 }
  0x73   :  { %1170 = vmatpush3.bf16.msra.mxu1 %v1283_v0  ;;  %1175 = vmatprep.subr.bf16.mxu0 %v1421_v39 }
  0x74   :  { %1195 = vmatprep.subr.bf16.mxu1 %v1421_v39 }
  0x75   :  { %678 = vmatmul.mubr.bf16.vlgmr.msra.gmra.mxu0 %v985_v2 }
  0x76   :  { %1172 = vmatmul.mubr.bf16.vlgmr.msra.gmra.mxu1 %v1286_v1  ;;  %1191 = vmatprep.mubr.msk.bf16.mxu0 %vm1422_vm0, %v1421_v39 }
  0x77   :  { %1211 = vmatprep.mubr.msk.bf16.mxu1 %vm1422_vm0, %v1421_v39  ;;  %1176 = vmatpush3.bf16.msra.mxu0 %v1287_v3 }
  0x78   :  { %1177 = vmatprep.subr.bf16.mxu0 %v1421_v39  ;;  %1196 = vmatpush3.bf16.msra.mxu1 %v1295_v11 }
  0x79   :  { %1197 = vmatprep.subr.bf16.mxu1 %v1421_v39 }
  0x7b   :  { %1178 = vmatpush3.bf16.msra.mxu0 %v1288_v4 }
  0x7c   :  { %1179 = vmatprep.subr.bf16.mxu0 %v1421_v39  ;;  %1198 = vmatpush3.bf16.msra.mxu1 %v1296_v12 }
  0x7d   :  { %1199 = vmatprep.subr.bf16.mxu1 %v1421_v39 }
  0x7f   :  { %1180 = vmatpush3.bf16.msra.mxu0 %v1289_v5 }
  0x80   :  { %1181 = vmatprep.subr.bf16.mxu0 %v1421_v39  ;;  %1200 = vmatpush3.bf16.msra.mxu1 %v1297_v13 }
  0x81   :  { %1201 = vmatprep.subr.bf16.mxu1 %v1421_v39 }
  0x83   :  { %1182 = vmatpush3.bf16.msra.mxu0 %v1290_v6 }
  0x84   :  { %1183 = vmatprep.subr.bf16.mxu0 %v1421_v39  ;;  %1202 = vmatpush3.bf16.msra.mxu1 %v1298_v14 }
  0x85   :  { %1203 = vmatprep.subr.bf16.mxu1 %v1421_v39 }
  0x87   :  { %1184 = vmatpush3.bf16.msra.mxu0 %v1291_v7 }
  0x88   :  { %1185 = vmatprep.subr.bf16.mxu0 %v1421_v39  ;;  %1204 = vmatpush3.bf16.msra.mxu1 %v1299_v15 }
  0x89   :  { %1205 = vmatprep.subr.bf16.mxu1 %v1421_v39 }
  0x8b   :  { %1186 = vmatpush3.bf16.msra.mxu0 %v1292_v8 }
  0x8c   :  { %1187 = vmatprep.subr.bf16.mxu0 %v1421_v39  ;;  %1206 = vmatpush3.bf16.msra.mxu1 %v1300_v16 }
  0x8d   :  { %1207 = vmatprep.subr.bf16.mxu1 %v1421_v39 }
  0x8f   :  { %1188 = vmatpush3.bf16.msra.mxu0 %v1293_v9 }
  0x90   :  { %1189 = vmatprep.subr.bf16.mxu0 %v1421_v39  ;;  %1208 = vmatpush3.bf16.msra.mxu1 %v1301_v44 }
  0x91   :  { %1209 = vmatprep.subr.bf16.mxu1 %v1421_v39 }
  0x93   :  { %1190 = vmatpush3.bf16.msra.mxu0 %v1294_v10 }
  0x94   :  { %1210 = vmatpush3.bf16.msra.mxu1 %v1302_v45 }
 0x115   :  { %v1078_v17 = vpop.f32.mrf.mxu0 }
 0x116   :  { %v1100_v18 = vpop.f32.mrf.mxu1 }
 0x117   :  { %v1079_v19 = vpop.f32.mrf.mxu0 }
 0x118   :  { %v1101_v20 = vpop.f32.mrf.mxu1  ;;  %v1080_v25 = vadd.f32 %v1079_v19, %v1078_v17 }
 0x119   :  { %v1081_v21 = vpop.f32.mrf.mxu0  ;;  %v1102_v28 = vadd.f32 %v1101_v20, %v1100_v18 }
 0x11a   :  { %v1103_v22 = vpop.f32.mrf.mxu1  ;;  %v600_v27 = vadd.f32 %v1080_v25, %v980_v26 }
 0x11b   :  { %v1082_v23 = vpop.f32.mrf.mxu0 }
 0x11c   :  { %v1104_v24 = vpop.f32.mrf.mxu1  ;;  %v640_v32 = vadd.f32 %v1102_v28, %v600_v27 }
 0x135   :  { %v1122_v29 = vpop.f32.mrf.mxu0 }
 0x136   :  { %v719_v30 = vpop.f32.mrf.mxu1 }
 0x137   :  { %v1123_v31 = vpop.f32.mrf.mxu0 }
 0x138   :  { %v1124_v33 = vadd.f32 %v1123_v31, %v1122_v29  ;;  %v1173_v34 = vpop.f32.mrf.mxu1 }
 0x139   :  { %v1125_v35 = vpop.f32.mrf.mxu0 }
 0x13a   :  { %v680_v36 = vadd.f32 %v1124_v33, %v640_v32  ;;  %v722_v37 = vpop.f32.mrf.mxu1 }
 0x13b   :  { %v1126_v38 = vpop.f32.mrf.mxu0 }
 0x13c   :  { %v720_v40 = vadd.f32 %v719_v30, %v680_v36  ;;  %v1174_v41 = vpop.f32.mrf.mxu1 }
 0x13e   :  { %v725_v42 = vmax.f32 %v720_v40, 0.0 }
 0x140   :  { %v726_v43 = vpack.c.bf16 %v725_v42, %v725_v42 }
 0x142   :  { %1192 = vmatmul.mubr.bf16.vlgmr.msra.gmra.mxu0 %v726_v43 }
 0x202   :  { %v832_v47 = vpop.f32.mrf.mxu0 }
 0x203   :  { %v833_v48 = vadd.f32 %v1044_v46, %v832_v47 }
 0x204   :  { %v1193_v49 = vpop.f32.mrf.mxu0 }
 0x205   :  { %v838_v50 = vmax.f32 %v833_v48, 0.0 }
 0x206   :  { %v835_v51 = vpop.f32.mrf.mxu0 }
 0x207   :  { %v839_v52 = vpack.c.bf16 %v838_v50, %v838_v50 }
 0x208   :  { %v1194_v53 = vpop.f32.mrf.mxu0 }
 0x209   :  { %1212 = vmatmul.mubr.bf16.vlgmr.msra.gmra.mxu1 %v839_v52 }
 0x2c9   :  { %v945_v55 = vpop.f32.mrf.mxu1 }
 0x2ca   :  { %v946_v39 = vadd.f32 %v1053_v54, %v945_v55 }
 0x2cb   :  { %v1213_v56 = vpop.f32.mrf.mxu1 }
 0x2cc   :  { %951 = vmax.xlane.f32.xlu0 %v946_v39 }
 0x2cd   :  { %v948_v57 = vpop.f32.mrf.mxu1 }
 0x2cf   :  { %v1214_v58 = vpop.f32.mrf.mxu1 }
 0x355   :  { %v952_v59 = vpop.xlane.xlu0 %951 }
 0x356   :  { %v953_v60 = vsub.f32 %v946_v39, %v952_v59 }
 0x358   :  { %v954_v61 = vmul.f32 1.442695, %v953_v60 }
 0x35a   :  { %1303 = vpow2.f32 %v954_v61 }
 0x367   :  { %v1304_v62 = vpop.eup %1303 }
 0x368   :  { %956 = vadd.xlane.f32.xlu0 %v1304_v62 }
 0x3f1   :  { %v957_v63 = vpop.xlane.xlu0 %956 }
 0x3f2   :  { %1305 = vlog2.f32 %v957_v63 }
 0x3ff   :  { %v1306_v0 = vpop.eup %1305 }
 0x400   :  { %v959_v1 = vmul.f32 0.6931472, %v1306_v0 }
 0x402   :  { %v960_v2 = vadd.f32 %v959_v1, %v952_v59 }
 0x404   :  { %v961_v3 = vsub.f32 %v946_v39, %v960_v2 }
 0x406   :  { %962 = vst [vmem:[#allocation10] sm:$0xff] %v961_v3 }
 0x407   :  { %1398 = shalt.err (!%p1395_p10)
}
 0x408   :  { %972 = dma.vmem_to_hbm [thread:$0]  %s970_s24, 128, %s1534_s7, [#allocation4]  }
 0x409   :  { %1413 = dma.done.wait [#allocation4], 128  }
 0x40a   :  { %1414 = vsyncadd [#allocation4], 4294967168 }
 0x40b   :  { %976 = vsyncpa [#allocation3], 1 }
 0x40c   :  { %977 = vsyncpa [#allocation6], 1 }
 0x40d   :  { %978 = vsyncpa [#allocation9], 1 }
 0x40e   :  { %979 = vsyncpa [#allocation4], 1 }

</bundles_post_ra>
